<compile_context>
chip_gen: v7x
topology: tpu7x:2x2x1
jax: 0.10.0
libtpu: 0.0.40
codegen_flags: <defaults>
</compile_context>

<pallas_src>
import functools
import math

import jax
import jax.numpy as jnp
from jax import lax
from jax.experimental import pallas as pl
from jax.experimental.pallas import tpu as pltpu


def _vmem_limit_bytes():
    """~75% of physical VMEM; conservative 64 MiB assumption if undetectable."""
    cap = 64 * 1024 * 1024  # safe default (v7x per-TC physical VMEM)
    try:
        info = pltpu.get_tpu_info()
        c = getattr(info, "vmem_capacity_bytes", None)
        if c:
            cap = int(c)
    except Exception:
        pass
    return int(min((cap * 3) // 4, 100 * 1024 * 1024))


_VMEM_LIMIT = _vmem_limit_bytes()


# --------------------------------------------------------------------------
# Linear projection kernel:  y = x @ W_t + b   (row-tiled, bf16 MXU, f32 acc)
# --------------------------------------------------------------------------
def _linear_kernel(x_ref, w_ref, b_ref, o_ref):
    acc = jnp.dot(
        x_ref[...].astype(jnp.bfloat16),
        w_ref[...],  # already bf16
        preferred_element_type=jnp.float32,
    ) + b_ref[...]
    o_ref[...] = acc.astype(o_ref.dtype)


def _linear(x2d, w_t_bf16, b_row, *, out_dtype=jnp.float32, tm=1024):
    m, din = x2d.shape
    dout = w_t_bf16.shape[1]
    tile_m = m if m <= tm else tm
    grid = (pl.cdiv(m, tile_m),)
    return pl.pallas_call(
        _linear_kernel,
        out_shape=jax.ShapeDtypeStruct((m, dout), out_dtype),
        grid=grid,
        in_specs=[
            pl.BlockSpec((tile_m, din), lambda i: (i, 0)),
            pl.BlockSpec((din, dout), lambda i: (0, 0)),   # resident bf16 weights
            pl.BlockSpec((1, dout), lambda i: (0, 0)),
        ],
        out_specs=pl.BlockSpec((tile_m, dout), lambda i: (i, 0)),
        compiler_params=pltpu.CompilerParams(
            dimension_semantics=("parallel",),
            vmem_limit_bytes=_VMEM_LIMIT,
        ),
    )(x2d, w_t_bf16, b_row)


# --------------------------------------------------------------------------
# individual_attention kernel: one (batch, query-tile) per grid point,
# static loop over heads inside (head-packed lane-dense output).
# --------------------------------------------------------------------------
def _attn_kernel(gamma_ref, mask_ref, tri_ref, q_ref, k_ref, v_ref,
                 out_ref, attn_ref, *, n_heads, d_k, tq):
    q_all = q_ref[0]          # (Tq, d_model) bf16
    k_all = k_ref[0]          # (S,  d_model) bf16
    v_all = v_ref[0]          # (S,  d_model) bf16
    mask = mask_ref[...]      # (Tq, S) float 0/1
    tri = tri_ref[...]        # (S, S) bf16, tri[k, j] = (k > j)

    S = mask.shape[-1]

    # |i - j| position effect generated in-kernel (no per-step (Tq,S) DMA).
    q0 = pl.program_id(1) * tq
    row = lax.broadcasted_iota(jnp.int32, (tq, S), 0) + q0
    col = lax.broadcasted_iota(jnp.int32, (tq, S), 1)
    pos = jnp.abs(row - col).astype(jnp.float32)

    neg_big = jnp.float32(-1e32)
    scale = jnp.float32(1.0 / math.sqrt(d_k))
    mask_is_zero = mask == 0

    outs = []
    for hh in range(n_heads):
        lo = hh * d_k
        qh = q_all[:, lo:lo + d_k]
        kh = k_all[:, lo:lo + d_k]
        vh = v_all[:, lo:lo + d_k]

        # Q K^T without materializing a K transpose (contract last dims).
        scores = lax.dot_general(
            qh, kh, (((1,), (1,)), ((), ())),
            preferred_element_type=jnp.float32,
        ) * scale

        # --- "no-grad" branch: distance-aware decay factor -----------------
        s1 = jnp.where(mask_is_zero, neg_big, scores)
        m1 = jnp.max(s1, axis=-1, keepdims=True)
        e1 = jnp.exp(s1 - m1)
        p1 = e1 * pl.reciprocal(jnp.sum(e1, axis=-1, keepdims=True), approx=True)
        scores_ = p1 * mask

        # suffix sum over k > j:  (scores_ @ T) == disttotal - distcum.
        # No cancellation -> bf16 MXU operands with f32 accumulation are safe.
        suffix = jnp.dot(scores_.astype(jnp.bfloat16), tri,
                         preferred_element_type=jnp.float32)
        dist_scores = jnp.sqrt(jnp.maximum(suffix * pos, 0.0))

        gamma = gamma_ref[hh]                      # = -softplus(gammas[h]), scalar
        total_effect = jnp.clip(jnp.exp(dist_scores * gamma), 1e-5, 1e5)
        # --------------------------------------------------------------------

        s2 = jnp.where(mask_is_zero, neg_big, scores * total_effect)
        m2 = jnp.max(s2, axis=-1, keepdims=True)
        e2 = jnp.exp(s2 - m2)
        attn = e2 * pl.reciprocal(jnp.sum(e2, axis=-1, keepdims=True), approx=True)

        attn_ref[0, hh] = attn.astype(attn_ref.dtype)
        # TODO(synk): nn.Dropout(p) on attn is identity in eval mode; skipped here.
        outs.append(
            jnp.dot(attn.astype(jnp.bfloat16), vh,
                    preferred_element_type=jnp.float32)
        )

    # Single lane-dense (Tq, d_model) bf16 store, heads packed along lanes.
    out_ref[0] = jnp.concatenate(outs, axis=-1).astype(out_ref.dtype)


def _pick_tq(S, n_heads, d_model, vmem_budget):
    """Query-tile size: fit the Tq-independent residents (double-buffered bf16
    tri and K/V blocks) plus the per-query-row footprint (q/out/mask/attn
    blocks and in-kernel f32 temporaries) into the scoped-VMEM budget."""
    if S <= 256 or S % 8 != 0:
        return S

    # Tq-independent residents (double-buffered by the BlockSpec pipeline).
    resident = 2 * (S * S * 2)              # tri_strict, bf16
    resident += 2 * 2 * (S * d_model * 2)   # K and V blocks, bf16
    budget = vmem_budget - resident - (2 << 20)   # slack for compiler scratch
    if budget <= 0:
        budget = vmem_budget // 4           # last resort; rely on limit headroom

    per_row = (
        2 * d_model * 2            # q block (bf16, double-buffered)
        + 2 * d_model * 2          # out block (bf16, double-buffered)
        + 2 * S * 4                # mask block (f32, double-buffered)
        + 2 * n_heads * S * 2      # attn block (bf16, double-buffered)
        + 12 * S * 4               # in-kernel f32 (Tq,S) temporaries
    )
    # Floor at 128 (MXU M-dim); budget normally allows >=256 on v6e/v7x.
    tq = max((budget // per_row) // 8 * 8, min(128, S))
    tq = min(tq, S)
    while S % tq != 0:
        tq -= 8
    return max(tq, 8)


def _individual_attention(q, k, v, mask2d, tri_strict, neg_sp_gamma,
                          n_heads, d_k, attn_dtype=jnp.bfloat16):
    bs, S, d_model = q.shape
    tq = _pick_tq(S, n_heads, d_model, _VMEM_LIMIT)
    n_qt = S // tq

    kernel = functools.partial(_attn_kernel, n_heads=n_heads, d_k=d_k, tq=tq)

    q_spec = pl.BlockSpec((1, tq, d_model), lambda b, qi: (b, qi, 0))
    kv_spec = pl.BlockSpec((1, S, d_model), lambda b, qi: (b, 0, 0))
    mask_spec = pl.BlockSpec((tq, S), lambda b, qi: (qi, 0))
    tri_spec = pl.BlockSpec((S, S), lambda b, qi: (0, 0))
    out_spec = pl.BlockSpec((1, tq, d_model), lambda b, qi: (b, qi, 0))
    attn_spec = pl.BlockSpec((1, n_heads, tq, S), lambda b, qi: (b, 0, qi, 0))

    out, attn = pl.pallas_call(
        kernel,
        out_shape=(
            jax.ShapeDtypeStruct((bs, S, d_model), jnp.bfloat16),
            jax.ShapeDtypeStruct((bs, n_heads, S, S), attn_dtype),
        ),
        grid=(bs, n_qt),
        in_specs=[
            pl.BlockSpec(memory_space=pltpu.MemorySpace.SMEM),  # gammas
            mask_spec,   # mask rows for this query tile (arbitrary user mask)
            tri_spec,    # resident strict-triangular suffix-sum matrix (bf16)
            q_spec,
            kv_spec,
            kv_spec,
        ],
        out_specs=(out_spec, attn_spec),
        compiler_params=pltpu.CompilerParams(
            dimension_semantics=("parallel", "parallel"),
            vmem_limit_bytes=_VMEM_LIMIT,
        ),
    )(neg_sp_gamma, mask2d, tri_strict, q, k, v)
    return out, attn


# --------------------------------------------------------------------------
# Module forward (glue in plain JAX, hot paths in Pallas kernels)
# --------------------------------------------------------------------------
def mha_individual_forward(params, q_in, k_in, v_in, mask2d, *,
                           attn_dtype=jnp.bfloat16):
    bs, S, d_model = q_in.shape
    h = params["n_heads"]
    d_k = d_model // h

    # Weights cast to bf16 once (MXU-native rate); biases stay f32.
    k_w = params["k_w_t"].astype(jnp.bfloat16)
    v_w = params["v_w_t"].astype(jnp.bfloat16)
    o_w = params["out_w_t"].astype(jnp.bfloat16)

    # kq_same=True: q and k share k_linear -> one fused row-stacked matmul.
    kq_rows = jnp.concatenate(
        [k_in.reshape(bs * S, d_model), q_in.reshape(bs * S, d_model)], axis=0)
    kq = _linear(kq_rows, k_w, params["k_b"], out_dtype=jnp.bfloat16)
    k = kq[: bs * S].reshape(bs, S, d_model)
    q = kq[bs * S:].reshape(bs, S, d_model)
    v = _linear(v_in.reshape(bs * S, d_model), v_w, params["v_b"],
                out_dtype=jnp.bfloat16).reshape(bs, S, d_model)

    neg_sp_gamma = (-jax.nn.softplus(params["gammas"].reshape(h))).astype(jnp.float32)

    # Strict triangular suffix-sum matrix, hoisted out of the kernel:
    #   T[k, j] = 1 iff k > j  =>  (scores_ @ T)[q, j] = sum_{k>j} scores_[q, k]
    idx = jnp.arange(S)
    tri_strict = (idx[:, None] > idx[None, :]).astype(jnp.bfloat16)

    out, attn_scores = _individual_attention(
        q, k, v, mask2d, tri_strict, neg_sp_gamma, h, d_k, attn_dtype=attn_dtype
    )

    output = _linear(
        out.reshape(bs * S, d_model), o_w, params["out_b"], out_dtype=jnp.float32
    ).reshape(bs, S, d_model)
    return output, attn_scores


# --------------------------------------------------------------------------
# Pure-JAX f32 reference (mirrors the PyTorch forward) for correctness checking
# --------------------------------------------------------------------------
def reference_forward(params, q_in, k_in, v_in, mask2d):
    bs, S, d_model = q_in.shape
    h = params["n_heads"]
    d_k = d_model // h

    def proj(x, w_t, b):
        y = x.reshape(bs * S, d_model) @ w_t + b
        return y.reshape(bs, S, h, d_k).transpose(0, 2, 1, 3)

    k = proj(k_in, params["k_w_t"], params["k_b"])
    q = proj(q_in, params["k_w_t"], params["k_b"])
    v = proj(v_in, params["v_w_t"], params["v_b"])

    mask = mask2d[None, None, :, :]
    scores = jnp.einsum("bhqd,bhkd->bhqk", q, k) / math.sqrt(d_k)

    s_masked = jnp.where(mask == 0, -1e32, scores)
    scores_ = jax.nn.softmax(s_masked, axis=-1) * mask
    distcum = jnp.cumsum(scores_, axis=-1)
    disttotal = jnp.sum(scores_, axis=-1, keepdims=True)
    x1 = jnp.arange(S, dtype=jnp.float32)[None, :]
    x2 = jnp.arange(S, dtype=jnp.float32)[:, None]
    position_effect = jnp.abs(x1 - x2)[None, None, :, :]
    dist_scores = jnp.sqrt(jnp.maximum((disttotal - distcum) * position_effect, 0.0))
    gamma = (-jax.nn.softplus(params["gammas"]))[None, :, :, :]  # (1, h, 1, 1)
    total_effect = jnp.clip(jnp.exp(dist_scores * gamma), 1e-5, 1e5)

    scores = scores * total_effect
    scores = jnp.where(mask == 0, -1e32, scores)
    attn = jax.nn.softmax(scores, axis=-1)
    out_heads = jnp.einsum("bhqk,bhkd->bhqd", attn, v)

    concat = out_heads.transpose(0, 2, 1, 3).reshape(bs * S, d_model)
    output = (concat @ params["out_w_t"] + params["out_b"]).reshape(bs, S, d_model)
    return output, attn


# --------------------------------------------------------------------------
# Deterministic parameter init (synthetic, not a checkpoint load)
# --------------------------------------------------------------------------
def init_params(key, d_model, n_heads):
    k1, k2, k3, k4 = jax.random.split(key, 4)
    limit = math.sqrt(6.0 / (d_model + d_model))  # xavier_uniform for square Linear

    def xavier(kk):
        return jax.random.uniform(kk, (d_model, d_model), jnp.float32, -limit, limit)

    return {
        "n_heads": n_heads,
        # Linear weights stored as (in, out) = W.T, biases as (1, out) rows.
        "k_w_t": xavier(k1).T,
        "k_b": jnp.zeros((1, d_model), jnp.float32),
        "v_w_t": xavier(k2).T,
        "v_b": jnp.zeros((1, d_model), jnp.float32),
        "out_w_t": xavier(k3).T,
        "out_b": jnp.zeros((1, d_model), jnp.float32),
        "gammas": jax.random.uniform(k4, (n_heads, 1, 1), jnp.float32, -1.0, 1.0),
    }


if __name__ == "__main__":
    bs, S, d_model, n_heads = 2, 8, 32, 4

    key = jax.random.PRNGKey(0)
    kp, kq, kk, kv = jax.random.split(key, 4)
    params = init_params(kp, d_model, n_heads)

    q_in = jax.random.normal(kq, (bs, S, d_model), jnp.float32)
    k_in = jax.random.normal(kk, (bs, S, d_model), jnp.float32)
    v_in = jax.random.normal(kv, (bs, S, d_model), jnp.float32)

    # causal mask (broadcasts over batch / heads), float 0/1
    mask2d = jnp.tril(jnp.ones((S, S), jnp.float32))

    output, attn_scores = mha_individual_forward(params, q_in, k_in, v_in, mask2d)
    output, attn_scores = jax.block_until_ready((output, attn_scores))

    ref_out, ref_attn = reference_forward(params, q_in, k_in, v_in, mask2d)

    # Tolerances reflect bf16 MXU operands + bf16 q/k/v/out/attn storage and the
    # approx EUP reciprocal; the f32 reference uses full precision throughout.
    err_out = float(jnp.max(jnp.abs(output - ref_out)))
    err_attn = float(jnp.max(jnp.abs(attn_scores.astype(jnp.float32) - ref_attn)))
    assert err_out < 1e-1, "output mismatch: %e" % err_out
    assert err_attn < 5e-2, "attn mismatch: %e" % err_attn

    print("KERNEL_OK")
</pallas_src>

<mosaic_0001>
module attributes {stable_mosaic.version = 11 : i64} {
  func.func @_linear_kernel(%arg0: i32, %arg1: memref<32x32xf32, #tpu.memory_space<vmem>>, %arg2: memref<32x32xbf16, #tpu.memory_space<vmem>>, %arg3: memref<1x32xf32, #tpu.memory_space<vmem>>, %arg4: memref<32x32xbf16, #tpu.memory_space<vmem>>) attributes {dimension_semantics = [#tpu.dimension_semantics<parallel>], iteration_bounds = array<i64: 1>, scalar_prefetch = 0 : i64, scratch_operands = 0 : i64, tpu.core_type = #tpu.core_type<tc>, window_params = [{transform_indices = @transform_0, window_bounds = array<i64: 32, 32>}, {pipeline_mode = #tpu.pipeline_mode<synchronous>, transform_indices = @transform_1, window_bounds = array<i64: 32, 32>}, {pipeline_mode = #tpu.pipeline_mode<synchronous>, transform_indices = @transform_2, window_bounds = array<i64: 1, 32>}, {transform_indices = @transform_3, window_bounds = array<i64: 32, 32>}]} {
    %c0 = arith.constant 0 : index
    %c0_0 = arith.constant 0 : index
    %0 = vector.load %arg1[%c0, %c0_0] : memref<32x32xf32, #tpu.memory_space<vmem>>, vector<32x32xf32>
    %1 = arith.truncf %0 : vector<32x32xf32> to vector<32x32xbf16>
    %c0_1 = arith.constant 0 : index
    %c0_2 = arith.constant 0 : index
    %2 = vector.load %arg2[%c0_1, %c0_2] : memref<32x32xbf16, #tpu.memory_space<vmem>>, vector<32x32xbf16>
    %cst = arith.constant dense<0.000000e+00> : vector<32x32xf32>
    %3 = tpu.matmul %1, %2, %cst {dimension_numbers = #tpu.dot_dimension_numbers<[1], [0], [0], [1], [0, 0, 1, 1], [], []>} : vector<32x32xbf16>, vector<32x32xbf16>, vector<32x32xf32> -> vector<32x32xf32>
    %c0_3 = arith.constant 0 : index
    %c0_4 = arith.constant 0 : index
    %4 = vector.load %arg3[%c0_3, %c0_4] : memref<1x32xf32, #tpu.memory_space<vmem>>, vector<1x32xf32>
    %5 = vector.broadcast %4 : vector<1x32xf32> to vector<32x32xf32>
    %6 = arith.addf %3, %5 : vector<32x32xf32>
    %7 = arith.truncf %6 : vector<32x32xf32> to vector<32x32xbf16>
    %c0_5 = arith.constant 0 : index
    %c0_6 = arith.constant 0 : index
    %8 = vector.load %arg4[%c0_5, %c0_6] : memref<32x32xbf16, #tpu.memory_space<vmem>>, vector<32x32xbf16>
    tpu.vector_store %arg4[%c0_5, %c0_6], %7 {strides = array<i32>} : memref<32x32xbf16, #tpu.memory_space<vmem>>, vector<32x32xbf16>,
    return
  }
  func.func @transform_0(%arg0: i32) -> (i32, i32) {
    %c0_i32 = arith.constant 0 : i32
    %c0_i32_0 = arith.constant 0 : i32
    return %arg0, %c0_i32 : i32, i32
  }
  func.func @transform_1(%arg0: i32) -> (i32, i32) {
    %c0_i32 = arith.constant 0 : i32
    %c0_i32_0 = arith.constant 0 : i32
    %c0_i32_1 = arith.constant 0 : i32
    return %c0_i32, %c0_i32_0 : i32, i32
  }
  func.func @transform_2(%arg0: i32) -> (i32, i32) {
    %c0_i32 = arith.constant 0 : i32
    %c0_i32_0 = arith.constant 0 : i32
    %c0_i32_1 = arith.constant 0 : i32
    return %c0_i32, %c0_i32_0 : i32, i32
  }
  func.func @transform_3(%arg0: i32) -> (i32, i32) {
    %c0_i32 = arith.constant 0 : i32
    %c0_i32_0 = arith.constant 0 : i32
    return %arg0, %c0_i32 : i32, i32
  }
}

</mosaic_0001>

<bundles_post_ra>
// kernel: tpu_custom_call.1
= control target key start
LH: loop header
LB: loop body
LE: loop exit
PB: predicated region body
PF: predicated region fallthrough
CT: control target
= control target key end

     0   :  { %8 = vsyncpa [#allocation3], 0  ;;  %s350_s0 = inlined_call_operand.hbm [shape: f32[32,32], index: 0, kind: input, shape index: {}]   ;;  %s351_s1 = inlined_call_operand.hbm [shape: bf16[32,32], index: 1, kind: input, shape index: {}]   ;;  %s352_s2 = inlined_call_operand.vmem [shape: f32[1,32], index: 2, kind: input, shape index: {}]   ;;  %s353_s3 = inlined_call_operand.hbm [shape: bf16[32,32], index: 3, kind: output, shape index: {}]  }
   0x1   :  { %9 = vsyncpa [#allocation6], 0 }
   0x2   :  { %10 = vsyncpa [#allocation4], 0  ;;  %s274_s12 = smov [#allocation2]   ;;  %s202_s16 = scalar_lea.hbm %s350_s0, 512 }
   0x3   :  { %s16_s13 = sshll.u32 %s274_s12, 4  ;;  %p203_p0 = scmp.ne.s32.totalorder %s350_s0, %s202_s16  ;;  %s17_s13 = int_to_ptr.vmem [resolvable:$true] %s16_s13 }
   0x4   :  { %p206_p1 = scmp.lt.u32.totalorder %s202_s16, %s350_s0 }
   0x6   :  { %p208_p2 = pnand %p206_p1, %p203_p0 }
   0x8   :  { %211 = shalt.err (!%p208_p2)
}
   0x9   :  { %s212_s21 = scalar_lea.vmem %s17_s13, 512  ;;  %p217_p4 = scmp.lt.s32.totalorder %s17_s13, %s17_s13 }
   0xa   :  { %p213_p3 = scmp.ne.s32.totalorder %s17_s13, %s212_s21  ;;  %p218_p5 = scmp.lt.s32.totalorder %s212_s21, %s212_s21 }
   0xc   :  { %p219_p6 = por %p218_p5, %p217_p4 }
   0xe   :  { %p220_p7 = pnand %p219_p6, %p213_p3 }
  0x10   :  { %223 = shalt.err (!%p220_p7)
}
  0x11   :  { %s275_s22 = smov 128   ;;  %s276_s23 = smov 8  }
  0x12   :  { %22 = dma.hbm_to_vmem [thread:$0]  %s350_s0, 512, %s17_s13, [#allocation3], %s275_s22, %s275_s22, %s276_s23  }
  0x13   :  { %s277_s26 = smov [#allocation5]   ;;  %s224_s30 = scalar_lea.hbm %s351_s1, 256 }
  0x14   :  { %s28_s27 = sshll.u32 %s277_s26, 4  ;;  %p225_p8 = scmp.ne.s32.totalorder %s351_s1, %s224_s30  ;;  %s29_s27 = int_to_ptr.vmem [resolvable:$true] %s28_s27 }
  0x15   :  { %p228_p9 = scmp.lt.u32.totalorder %s224_s30, %s351_s1 }
  0x17   :  { %p230_p10 = pnand %p228_p9, %p225_p8 }
  0x19   :  { %233 = shalt.err (!%p230_p10)
}
  0x1a   :  { %s234_s8 = scalar_lea.vmem %s29_s27, 256  ;;  %p239_p12 = scmp.lt.s32.totalorder %s29_s27, %s29_s27 }
  0x1b   :  { %p235_p11 = scmp.ne.s32.totalorder %s29_s27, %s234_s8  ;;  %p240_p13 = scmp.lt.s32.totalorder %s234_s8, %s234_s8 }
  0x1d   :  { %p241_p0 = por %p240_p13, %p239_p12 }
  0x1f   :  { %p242_p1 = pnand %p241_p0, %p235_p11 }
  0x21   :  { %245 = shalt.err (!%p242_p1)
}
  0x22   :  { %s278_s0 = smov 64   ;;  %s279_s9 = smov 4  }
  0x23   :  { %34 = dma.hbm_to_vmem [thread:$0]  %s351_s1, 256, %s29_s27, [#allocation6], %s278_s0, %s278_s0, %s279_s9  }
  0x24   :  { %268 = dma.done.wait [#allocation3], 512  }
  0x25   :  { %269 = vsyncadd [#allocation3], 4294966784 }
  0x26   :  { %270 = dma.done.wait [#allocation6], 256  }
  0x27   :  { %271 = vsyncadd [#allocation6], 4294967040  ;;  %v200_v0 = vld [vmem:[#allocation5] sm:$0xff]   ;;  %v201_v1 = vld [vmem:[#allocation5 + $0x8] sm:$0xff]   ;;  %vm73_vm0 = vcmask 261120   ;;  %vm145_vm1 = vcmask 257024  }
  0x28   :  { %185 = vmatprep.subr.bf16.mxu0 %v200_v0  ;;  %v44_v2 = vld [vmem:[#allocation2] sm:$0xff]  ;;  %v45_v3 = vld [vmem:[#allocation2 + $0x8] sm:$0xff]  ;;  %v46_v5 = vld [vmem:[#allocation2 + $0x10] sm:$0xff]  ;;  %s280_s13 = smov [#allocation7]  }
  0x29   :  { %186 = vmatpush3.bf16.msra.mxu0 %v200_v0  ;;  %v48_v4 = vpack.c.bf16 %v45_v3, %v44_v2  ;;  %v47_v6 = vld [vmem:[#allocation2 + $0x18] sm:$0xff]  ;;  %v168_v8 = vld [vmem:[%s352_s2] ss:$0 sm:$0xff]  ;;  %s155_s14 = sshll.u32 %s280_s13, 4  ;;  %s156_s14 = int_to_ptr.vmem [resolvable:$true] %s155_s14 }
  0x2a   :  { %187 = vmatprep.subr.bf16.mxu0 %v201_v1  ;;  %v49_v7 = vpack.c.bf16 %v47_v6, %v46_v5  ;;  %s246_s2 = scalar_lea.vmem %s156_s14, 256  ;;  %p251_p3 = scmp.lt.s32.totalorder %s156_s14, %s156_s14 }
  0x2b   :  { %189 = vmatprep.mubr.msk.bf16.mxu0 %vm73_vm0, %v48_v4  ;;  %p247_p2 = scmp.ne.s32.totalorder %s156_s14, %s246_s2  ;;  %p252_p4 = scmp.lt.s32.totalorder %s246_s2, %s246_s2 }
  0x2d   :  { %188 = vmatpush3.bf16.msra.mxu0 %v201_v1  ;;  %p253_p5 = por %p252_p4, %p251_p3 }
  0x2f   :  { %p254_p6 = pnand %p253_p5, %p247_p2 }
  0x30   :  { %190 = vmatmul.mubr.msk.bf16.vlgmr.msra.gmra.mrb[0].mxu0 %vm73_vm0, %v49_v7 }
 0x103   :  { %v191_v9 = vpop.f32.mrb[0].mxu0 }
 0x104   :  { %v123_v10 = vadd.f32 %v191_v9, %v168_v8  ;;  %v114_v11 = vpop.f32.mrb[1].mxu0 }
 0x105   :  { %v115_v12 = vadd.f32 %v168_v8, %v114_v11  ;;  %v192_v13 = vpop.f32.mrb[2].mxu0 }
 0x106   :  { %v179_v14 = vpack.c.bf16 %v123_v10, %v123_v10  ;;  %v126_v15 = vadd.f32 %v192_v13, %v168_v8  ;;  %v117_v16 = vpop.f32.mrb[3].mxu0 }
 0x107   :  { %v177_v17 = vpack.c.bf16 %v115_v12, %v115_v12  ;;  %v118_v18 = vadd.f32 %v168_v8, %v117_v16 }
 0x108   :  { %148 = vst.msk [vmem:[#allocation7 + $0x8] sm:$0xf] %vm145_vm1, %v179_v14  ;;  %v180_v19 = vpack.c.bf16 %v126_v15, %v126_v15 }
 0x109   :  { %146 = vst.msk [vmem:[#allocation7] sm:$0xf] %vm145_vm1, %v177_v17  ;;  %v178_v20 = vpack.c.bf16 %v118_v18, %v118_v18 }
 0x10a   :  { %149 = vst.msk [vmem:[#allocation7 + $0xc] sm:$0xf] %vm145_vm1, %v180_v19 }
 0x10b   :  { %147 = vst.msk [vmem:[#allocation7 + $0x4] sm:$0xf] %vm145_vm1, %v178_v20 }
 0x10c   :  { %257 = shalt.err (!%p254_p6)
}
 0x10d   :  { %s258_s17 = scalar_lea.hbm %s353_s3, 256 }
 0x10e   :  { %p259_p7 = scmp.ne.s32.totalorder %s353_s3, %s258_s17  ;;  %p262_p8 = scmp.lt.u32.totalorder %s258_s17, %s353_s3 }
 0x110   :  { %p264_p9 = pnand %p262_p8, %p259_p7 }
 0x112   :  { %267 = shalt.err (!%p264_p9)
}
 0x113   :  { %161 = dma.vmem_to_hbm [thread:$0]  %s156_s14, 256, %s353_s3, [#allocation4], %s278_s0, %s278_s0, %s279_s9  }
 0x114   :  { %272 = dma.done.wait [#allocation4], 256  }
 0x115   :  { %273 = vsyncadd [#allocation4], 4294967040 }
 0x116   :  { %165 = vsyncpa [#allocation3], 1 }
 0x117   :  { %166 = vsyncpa [#allocation6], 1 }
 0x118   :  { %167 = vsyncpa [#allocation4], 1 }

</bundles_post_ra>
